<compile_context>
chip_gen: v6e
topology: v6e:2x2x1
jax: 0.10.0
libtpu: 0.0.40
codegen_flags: <defaults>
</compile_context>

<pallas_src>
import math

import jax
import jax.numpy as jnp
from jax import lax
from jax.experimental import pallas as pl
from jax.experimental.pallas import tpu as pltpu  # noqa: F401  (TPU backend)

# ----------------------------- config (DACEModelConfig analogue) -------------
NODE_LEN = 32          # config.node_length  (d_model)
HIDDEN_DIM = 64        # config.hidden_dim   (transformer dim_feedforward)
SEQ = 8                # sequence length implied by x.view(B, -1, node_length)
BATCH = 2
MLP_DIMS = (128, 64, 1)        # self.mlp_hidden_dims, output_dim = 1
LORA_R = (16, 8, 4)            # r for the three lora.Linear layers
LORA_SCALE = tuple(1.0 / r for r in LORA_R)   # loralib default lora_alpha=1
MAX_RUNTIME = 5000.0           # config.max_runtime
OUT_PAD = 128                  # lane padding for the final (out_dim=1) layer
LN_EPS = 1e-5
NEG_MASK = -1e30               # additive "minus infinity" for cross-batch keys

D, H = NODE_LEN, HIDDEN_DIM
M1, M2 = MLP_DIMS[0], MLP_DIMS[1]

# --- weight-slab row offsets (bf16 slab, 128 lanes wide, LoRA pre-merged) ----
WQ = 0
WK = WQ + D          # 32
WV = WK + D          # 64
WO = WV + D          # 96
W1 = WO + D          # 128
W2 = W1 + D          # 160
MW1 = W2 + H         # 224
MW2 = MW1 + D        # 256
MW3 = MW2 + M1       # 384
W_ROWS = MW3 + M2    # 448

# --- vector-slab row indices (f32 slab, 128 lanes wide) -----------------------
V_BQ, V_BK, V_BV, V_BO = 0, 1, 2, 3
V_LN1G, V_LN1B = 4, 5
V_B1, V_B2 = 6, 7
V_LN2G, V_LN2B = 8, 9
V_MB1, V_MB2, V_MB3 = 10, 11, 12
V_MASK = 13          # rows V_MASK .. V_MASK+B-1 hold the block-diagonal mask


def _round_up(n, m):
    return (n + m - 1) // m * m


# ----------------------------------- kernel ----------------------------------
def dace_lora_kernel(x_ref, x0_ref, w_ref, vec_ref, out_ref):
    BS = x_ref.shape[0]                 # B*S   (static)
    B = x0_ref.shape[0]                 # B     (static)

    x_all_bf = x_ref[...].astype(jnp.bfloat16)   # (B*S, D) bf16 MXU operand (K/V)
    x0 = x0_ref[...]                             # (B, D)   f32 residual path
    vecs = vec_ref[...]                          # (Vrows, 128) f32 biases/LN/mask

    def bf(t):
        return t.astype(jnp.bfloat16)

    def mm(a, row, rows, cols):
        """bf16 MXU matmul against a static slice of the weight slab, f32 acc."""
        return jnp.dot(bf(a), w_ref[row:row + rows, :cols],
                       preferred_element_type=jnp.float32)

    # ---- attention projections (nhead=1); query restricted to position 0 ----
    q0 = mm(x0, WQ, D, D) + vecs[V_BQ:V_BQ + 1, :D]                       # (B, D)
    k = (jnp.dot(x_all_bf, w_ref[WK:WK + D, :D],
                 preferred_element_type=jnp.float32)
         + vecs[V_BK:V_BK + 1, :D])                                       # (B*S, D)
    v = (jnp.dot(x_all_bf, w_ref[WV:WV + D, :D],
                 preferred_element_type=jnp.float32)
         + vecs[V_BV:V_BV + 1, :D])                                       # (B*S, D)

    # ---- de-batched attention: one (B, B*S) score matmul + block-diag mask ----
    scale = 1.0 / math.sqrt(D)
    scores = lax.dot_general(bf(q0), bf(k), (((1,), (1,)), ((), ())),
                             preferred_element_type=jnp.float32) * scale  # (B, B*S)
    scores = scores + vecs[V_MASK:V_MASK + B, :BS]

    s_max = jnp.max(scores, axis=-1, keepdims=True)
    s_exp = jnp.exp(scores - s_max)
    attn = s_exp * pl.reciprocal(jnp.sum(s_exp, axis=-1, keepdims=True), approx=True)

    ctx = jnp.dot(bf(attn), bf(v), preferred_element_type=jnp.float32)    # (B, D)
    attn_out = mm(ctx, WO, D, D) + vecs[V_BO:V_BO + 1, :D]                # (B, D)

    def layer_norm(hh, g_row, b_row):
        mu = jnp.mean(hh, axis=-1, keepdims=True)
        var = jnp.mean((hh - mu) * (hh - mu), axis=-1, keepdims=True)
        return ((hh - mu) * lax.rsqrt(var + LN_EPS)
                * vecs[g_row:g_row + 1, :D] + vecs[b_row:b_row + 1, :D])

    # post-norm TransformerEncoderLayer (norm_first=False); dropout = identity (eval)
    h = layer_norm(x0 + attn_out, V_LN1G, V_LN1B)                         # (B, D)

    # ---- feed-forward (ReLU activation) ----
    ff = jnp.maximum(mm(h, W1, D, H) + vecs[V_B1:V_B1 + 1, :H], 0.0)
    ff = mm(ff, W2, H, D) + vecs[V_B2:V_B2 + 1, :D]
    h2 = layer_norm(h + ff, V_LN2G, V_LN2B)                               # (B, D)

    # ---- LoRA MLP (LoRA merged into base weights; eval-exact) ----
    m = jnp.maximum(mm(h2, MW1, D, M1) + vecs[V_MB1:V_MB1 + 1, :M1], 0.0)
    m = jnp.maximum(mm(m, MW2, M1, M2) + vecs[V_MB2:V_MB2 + 1, :M2], 0.0)
    m = mm(m, MW3, M2, OUT_PAD) + vecs[V_MB3:V_MB3 + 1, :OUT_PAD]

    out_ref[...] = jax.nn.sigmoid(m)           # (B, OUT_PAD); only col 0 is real


# ------------------------------ parameter packing ------------------------------
def pack_weights(p):
    """One lane-padded bf16 slab with every matmul weight (LoRA pre-merged)."""
    def merge(wt, at, bt, s):
        # lora.Linear eval: y = x W^T + b + s * x A^T B^T == x (W^T + s A^T B^T) + b
        return wt + s * jnp.dot(at, bt)

    entries = [
        (WQ, p["wq_t"]), (WK, p["wk_t"]), (WV, p["wv_t"]), (WO, p["wo_t"]),
        (W1, p["w1_t"]), (W2, p["w2_t"]),
        (MW1, merge(p["m1_wt"], p["m1_at"], p["m1_bt"], LORA_SCALE[0])),
        (MW2, merge(p["m2_wt"], p["m2_at"], p["m2_bt"], LORA_SCALE[1])),
        (MW3, merge(p["m3_wt"], p["m3_at"], p["m3_bt"], LORA_SCALE[2])),
    ]
    slab = jnp.zeros((W_ROWS, 128), jnp.float32)
    for row, mat in entries:
        r, c = mat.shape
        slab = slab.at[row:row + r, :c].set(mat.astype(jnp.float32))
    return slab.astype(jnp.bfloat16)


def pack_vectors(p, attn_mask, batch):
    """One f32 slab: biases, LN params and the block-diagonal additive mask."""
    seq = attn_mask.shape[0]
    rows = _round_up(V_MASK + batch, 8)
    slab = jnp.zeros((rows, 128), jnp.float32)
    entries = [
        (V_BQ, p["bq"]), (V_BK, p["bk"]), (V_BV, p["bv"]), (V_BO, p["bo"]),
        (V_LN1G, p["ln1_g"]), (V_LN1B, p["ln1_b"]),
        (V_B1, p["b1"]), (V_B2, p["b2"]),
        (V_LN2G, p["ln2_g"]), (V_LN2B, p["ln2_b"]),
        (V_MB1, p["m1_b"]), (V_MB2, p["m2_b"]), (V_MB3, p["m3_b"]),
    ]
    for row, vec in entries:
        r, c = vec.shape
        slab = slab.at[row:row + r, :c].set(vec.astype(jnp.float32))

    # Block-diagonal additive mask for de-batched attention (query position 0):
    # key column b'*S+s gets attn_mask[0, s] for its own batch b'=b, -inf otherwise.
    row0 = jnp.tile(attn_mask[0, :].astype(jnp.float32), batch)          # (B*S,)
    same = jnp.arange(batch)[:, None] == (jnp.arange(batch * seq) // seq)[None, :]
    bmask = jnp.where(same, row0[None, :], NEG_MASK)                     # (B, B*S)
    slab = slab.at[V_MASK:V_MASK + batch, :batch * seq].set(bmask)
    return slab


# ----------------------------------- wrapper ----------------------------------
def dace_lora_forward(seq_encodings, attn_mask, params, max_runtime=MAX_RUNTIME):
    """Mirrors DACELora.forward (loss-fxn bookkeeping side effects excluded)."""
    B = seq_encodings.shape[0]
    x3 = seq_encodings.reshape(B, -1, NODE_LEN).astype(jnp.float32)      # (B, S, D)
    S = x3.shape[1]
    x_flat = x3.reshape(B * S, NODE_LEN)                                 # K/V path
    x0 = x3[:, 0, :]                                                     # query pos 0

    w_slab = pack_weights(params)
    v_slab = pack_vectors(params, attn_mask, B)

    # Gridless pallas_call: single invocation, all operands resident in VMEM,
    # no double-buffered pipelining (nothing to overlap for a 1-step kernel).
    out = pl.pallas_call(
        dace_lora_kernel,
        out_shape=jax.ShapeDtypeStruct((B, OUT_PAD), jnp.float32),
    )(x_flat, x0, w_slab, v_slab)

    preds_pos0 = out[:, 0]                                # sigmoid(...) at position 0
    predicted_runtimes = preds_pos0 * max_runtime / 1000.0
    return predicted_runtimes


# ------------------------------ parameter init --------------------------------
def init_params(key):
    Dl, Hl = NODE_LEN, HIDDEN_DIM
    ks = iter(jax.random.split(key, 32))

    def w(shape, scale=0.05):
        return (scale * jax.random.normal(next(ks), shape)).astype(jnp.float32)

    p = {}
    # Transformer encoder layer (weights stored transposed: (in, out))
    p["wq_t"], p["wk_t"], p["wv_t"], p["wo_t"] = (w((Dl, Dl)) for _ in range(4))
    p["bq"], p["bk"], p["bv"], p["bo"] = (w((1, Dl)) for _ in range(4))
    p["ln1_g"] = jnp.ones((1, Dl), jnp.float32)
    p["ln1_b"] = jnp.zeros((1, Dl), jnp.float32)
    p["w1_t"], p["b1"] = w((Dl, Hl)), w((1, Hl))
    p["w2_t"], p["b2"] = w((Hl, Dl)), w((1, Dl))
    p["ln2_g"] = jnp.ones((1, Dl), jnp.float32)
    p["ln2_b"] = jnp.zeros((1, Dl), jnp.float32)

    # LoRA MLP: lora.Linear(D,128,r=16), lora.Linear(128,64,r=8), lora.Linear(64,1,r=4)
    d0, d1, _ = MLP_DIMS
    p["m1_wt"], p["m1_b"] = w((Dl, d0)), w((1, d0))
    p["m1_at"], p["m1_bt"] = w((Dl, LORA_R[0])), w((LORA_R[0], d0))
    p["m2_wt"], p["m2_b"] = w((d0, d1)), w((1, d1))
    p["m2_at"], p["m2_bt"] = w((d0, LORA_R[1])), w((LORA_R[1], d1))
    # final layer: out_dim = 1, zero-padded to OUT_PAD lanes (only column 0 is real)
    w3 = jnp.zeros((d1, OUT_PAD), jnp.float32).at[:, 0].set(w((d1,)))
    b3 = jnp.zeros((1, OUT_PAD), jnp.float32).at[0, 0].set(0.1)
    bt3 = jnp.zeros((LORA_R[2], OUT_PAD), jnp.float32).at[:, 0].set(w((LORA_R[2],)))
    p["m3_wt"], p["m3_b"] = w3, b3
    p["m3_at"], p["m3_bt"] = w((d1, LORA_R[2])), bt3
    return p


# ----------------------------------- main --------------------------------------
if __name__ == "__main__":
    key = jax.random.PRNGKey(0)
    k_x, k_p = jax.random.split(key)

    # seq_encodings arrive flattened; forward_batch does x.view(B, -1, node_length)
    seq_encodings = jax.random.normal(k_x, (BATCH, SEQ * NODE_LEN), dtype=jnp.float32)
    attn_mask = jnp.zeros((SEQ, SEQ), dtype=jnp.float32)   # additive mask (no masking)
    params = init_params(k_p)

    # TODO(synk): loss_fxn state assignment (self.loss_fxn.preds / loss_masks /
    # real_run_times) is a training-time Python side effect with no kernel
    # equivalent; per-position preds for s > 0 are not materialized here — only
    # predicted_runtimes (which depends on sequence position 0) is produced.
    predicted_runtimes = dace_lora_forward(seq_encodings, attn_mask, params)
    jax.block_until_ready(predicted_runtimes)
    assert predicted_runtimes.shape == (BATCH,)
    assert bool(jnp.all(jnp.isfinite(predicted_runtimes)))
    print("KERNEL_OK")
</pallas_src>

<mosaic_0001>
module attributes {stable_mosaic.version = 11 : i64} {
  func.func @dace_lora_kernel(%arg0: memref<16x32xf32, #tpu.memory_space<vmem>>, %arg1: memref<2x32xf32, #tpu.memory_space<vmem>>, %arg2: memref<448x128xbf16, #tpu.memory_space<vmem>>, %arg3: memref<16x128xf32, #tpu.memory_space<vmem>>, %arg4: memref<2x128xf32, #tpu.memory_space<vmem>>) attributes {dimension_semantics = [], scalar_prefetch = 0 : i64, scratch_operands = 0 : i64, tpu.core_type = #tpu.core_type<tc>} {
    %c0 = arith.constant 0 : index
    %c0_0 = arith.constant 0 : index
    %0 = vector.load %arg0[%c0, %c0_0] : memref<16x32xf32, #tpu.memory_space<vmem>>, vector<16x32xf32>
    %1 = arith.truncf %0 : vector<16x32xf32> to vector<16x32xbf16>
    %c0_1 = arith.constant 0 : index
    %c0_2 = arith.constant 0 : index
    %2 = vector.load %arg1[%c0_1, %c0_2] : memref<2x32xf32, #tpu.memory_space<vmem>>, vector<2x32xf32>
    %c0_3 = arith.constant 0 : index
    %c0_4 = arith.constant 0 : index
    %3 = vector.load %arg3[%c0_3, %c0_4] : memref<16x128xf32, #tpu.memory_space<vmem>>, vector<16x128xf32>
    %4 = arith.truncf %2 : vector<2x32xf32> to vector<2x32xbf16>
    %c0_5 = arith.constant 0 : index
    %c0_6 = arith.constant 0 : index
    %5 = vector.load %arg2[%c0_5, %c0_6] : memref<448x128xbf16, #tpu.memory_space<vmem>>, vector<32x32xbf16>
    %cst = arith.constant dense<0.000000e+00> : vector<2x32xf32>
    %6 = tpu.matmul %4, %5, %cst {dimension_numbers = #tpu.dot_dimension_numbers<[1], [0], [0], [1], [0, 0, 1, 1], [], []>} : vector<2x32xbf16>, vector<32x32xbf16>, vector<2x32xf32> -> vector<2x32xf32>
    %7 = vector.extract_strided_slice %3 {offsets = [0, 0], sizes = [1, 32], strides = [1, 1]} : vector<16x128xf32> to vector<1x32xf32>
    %8 = vector.broadcast %7 : vector<1x32xf32> to vector<2x32xf32>
    %9 = arith.addf %6, %8 : vector<2x32xf32>
    %c32 = arith.constant 32 : index
    %c0_7 = arith.constant 0 : index
    %10 = vector.load %arg2[%c32, %c0_7] : memref<448x128xbf16, #tpu.memory_space<vmem>>, vector<32x32xbf16>
    %cst_8 = arith.constant dense<0.000000e+00> : vector<16x32xf32>
    %11 = tpu.matmul %1, %10, %cst_8 {dimension_numbers = #tpu.dot_dimension_numbers<[1], [0], [0], [1], [0, 0, 1, 1], [], []>} : vector<16x32xbf16>, vector<32x32xbf16>, vector<16x32xf32> -> vector<16x32xf32>
    %12 = vector.extract_strided_slice %3 {offsets = [1, 0], sizes = [1, 32], strides = [1, 1]} : vector<16x128xf32> to vector<1x32xf32>
    %13 = vector.broadcast %12 : vector<1x32xf32> to vector<16x32xf32>
    %14 = arith.addf %11, %13 : vector<16x32xf32>
    %c64 = arith.constant 64 : index
    %c0_9 = arith.constant 0 : index
    %15 = vector.load %arg2[%c64, %c0_9] : memref<448x128xbf16, #tpu.memory_space<vmem>>, vector<32x32xbf16>
    %cst_10 = arith.constant dense<0.000000e+00> : vector<16x32xf32>
    %16 = tpu.matmul %1, %15, %cst_10 {dimension_numbers = #tpu.dot_dimension_numbers<[1], [0], [0], [1], [0, 0, 1, 1], [], []>} : vector<16x32xbf16>, vector<32x32xbf16>, vector<16x32xf32> -> vector<16x32xf32>
    %17 = vector.extract_strided_slice %3 {offsets = [2, 0], sizes = [1, 32], strides = [1, 1]} : vector<16x128xf32> to vector<1x32xf32>
    %18 = vector.broadcast %17 : vector<1x32xf32> to vector<16x32xf32>
    %19 = arith.addf %16, %18 : vector<16x32xf32>
    %20 = arith.truncf %9 : vector<2x32xf32> to vector<2x32xbf16>
    %21 = arith.truncf %14 : vector<16x32xf32> to vector<16x32xbf16>
    %cst_11 = arith.constant dense<0.000000e+00> : vector<2x16xf32>
    %22 = tpu.matmul %20, %21, %cst_11 {dimension_numbers = #tpu.dot_dimension_numbers<[1], [1], [0], [0], [0, 0, 1, 0], [], []>} : vector<2x32xbf16>, vector<16x32xbf16>, vector<2x16xf32> -> vector<2x16xf32>
    %cst_12 = arith.constant 0.176776692 : f32
    %23 = vector.broadcast %cst_12 : f32 to vector<2x16xf32>
    %24 = arith.mulf %22, %23 : vector<2x16xf32>
    %25 = vector.extract_strided_slice %3 {offsets = [13, 0], sizes = [2, 16], strides = [1, 1]} : vector<16x128xf32> to vector<2x16xf32>
    %26 = arith.addf %24, %25 : vector<2x16xf32>
    %cst_13 = arith.constant dense<0xFF800000> : vector<2xf32>
    %27 = vector.multi_reduction <maximumf>, %26, %cst_13 [1] : vector<2x16xf32> to vector<2xf32>
    %28 = vector.shape_cast %27 : vector<2xf32> to vector<2x1xf32>
    %29 = vector.broadcast %28 : vector<2x1xf32> to vector<2x16xf32>
    %30 = arith.subf %26, %29 : vector<2x16xf32>
    %31 = math.exp %30 : vector<2x16xf32>
    %cst_14 = arith.constant dense<0.000000e+00> : vector<2xf32>
    %32 = vector.multi_reduction <add>, %31, %cst_14 [1] : vector<2x16xf32> to vector<2xf32>
    %33 = vector.shape_cast %32 : vector<2xf32> to vector<2x1xf32>
    %34 = tpu.reciprocal %33 {approx = true} : vector<2x1xf32> -> vector<2x1xf32>
    %35 = vector.broadcast %34 : vector<2x1xf32> to vector<2x16xf32>
    %36 = arith.mulf %31, %35 : vector<2x16xf32>
    %37 = arith.truncf %36 : vector<2x16xf32> to vector<2x16xbf16>
    %38 = arith.truncf %19 : vector<16x32xf32> to vector<16x32xbf16>
    %cst_15 = arith.constant dense<0.000000e+00> : vector<2x32xf32>
    %39 = tpu.matmul %37, %38, %cst_15 {dimension_numbers = #tpu.dot_dimension_numbers<[1], [0], [0], [1], [0, 0, 1, 1], [], []>} : vector<2x16xbf16>, vector<16x32xbf16>, vector<2x32xf32> -> vector<2x32xf32>
    %40 = arith.truncf %39 : vector<2x32xf32> to vector<2x32xbf16>
    %c96 = arith.constant 96 : index
    %c0_16 = arith.constant 0 : index
    %41 = vector.load %arg2[%c96, %c0_16] : memref<448x128xbf16, #tpu.memory_space<vmem>>, vector<32x32xbf16>
    %cst_17 = arith.constant dense<0.000000e+00> : vector<2x32xf32>
    %42 = tpu.matmul %40, %41, %cst_17 {dimension_numbers = #tpu.dot_dimension_numbers<[1], [0], [0], [1], [0, 0, 1, 1], [], []>} : vector<2x32xbf16>, vector<32x32xbf16>, vector<2x32xf32> -> vector<2x32xf32>
    %43 = vector.extract_strided_slice %3 {offsets = [3, 0], sizes = [1, 32], strides = [1, 1]} : vector<16x128xf32> to vector<1x32xf32>
    %44 = vector.broadcast %43 : vector<1x32xf32> to vector<2x32xf32>
    %45 = arith.addf %42, %44 : vector<2x32xf32>
    %46 = arith.addf %2, %45 : vector<2x32xf32>
    %cst_18 = arith.constant dense<0.000000e+00> : vector<2xf32>
    %47 = vector.multi_reduction <add>, %46, %cst_18 [1] : vector<2x32xf32> to vector<2xf32>
    %48 = vector.shape_cast %47 : vector<2xf32> to vector<2x1xf32>
    %cst_19 = arith.constant 3.200000e+01 : f32
    %49 = vector.broadcast %cst_19 : f32 to vector<2x1xf32>
    %50 = arith.divf %48, %49 : vector<2x1xf32>
    %51 = vector.broadcast %50 : vector<2x1xf32> to vector<2x32xf32>
    %52 = arith.subf %46, %51 : vector<2x32xf32>
    %53 = vector.broadcast %50 : vector<2x1xf32> to vector<2x32xf32>
    %54 = arith.subf %46, %53 : vector<2x32xf32>
    %55 = arith.mulf %52, %54 : vector<2x32xf32>
    %cst_20 = arith.constant dense<0.000000e+00> : vector<2xf32>
    %56 = vector.multi_reduction <add>, %55, %cst_20 [1] : vector<2x32xf32> to vector<2xf32>
    %57 = vector.shape_cast %56 : vector<2xf32> to vector<2x1xf32>
    %cst_21 = arith.constant 3.200000e+01 : f32
    %58 = vector.broadcast %cst_21 : f32 to vector<2x1xf32>
    %59 = arith.divf %57, %58 : vector<2x1xf32>
    %60 = vector.broadcast %50 : vector<2x1xf32> to vector<2x32xf32>
    %61 = arith.subf %46, %60 : vector<2x32xf32>
    %cst_22 = arith.constant 9.99999974E-6 : f32
    %62 = vector.broadcast %cst_22 : f32 to vector<2x1xf32>
    %63 = arith.addf %59, %62 : vector<2x1xf32>
    %64 = math.rsqrt %63 : vector<2x1xf32>
    %65 = vector.broadcast %64 : vector<2x1xf32> to vector<2x32xf32>
    %66 = arith.mulf %61, %65 : vector<2x32xf32>
    %67 = vector.extract_strided_slice %3 {offsets = [4, 0], sizes = [1, 32], strides = [1, 1]} : vector<16x128xf32> to vector<1x32xf32>
    %68 = vector.broadcast %67 : vector<1x32xf32> to vector<2x32xf32>
    %69 = arith.mulf %66, %68 : vector<2x32xf32>
    %70 = vector.extract_strided_slice %3 {offsets = [5, 0], sizes = [1, 32], strides = [1, 1]} : vector<16x128xf32> to vector<1x32xf32>
    %71 = vector.broadcast %70 : vector<1x32xf32> to vector<2x32xf32>
    %72 = arith.addf %69, %71 : vector<2x32xf32>
    %73 = arith.truncf %72 : vector<2x32xf32> to vector<2x32xbf16>
    %c128 = arith.constant 128 : index
    %c0_23 = arith.constant 0 : index
    %74 = vector.load %arg2[%c128, %c0_23] : memref<448x128xbf16, #tpu.memory_space<vmem>>, vector<32x64xbf16>
    %cst_24 = arith.constant dense<0.000000e+00> : vector<2x64xf32>
    %75 = tpu.matmul %73, %74, %cst_24 {dimension_numbers = #tpu.dot_dimension_numbers<[1], [0], [0], [1], [0, 0, 1, 1], [], []>} : vector<2x32xbf16>, vector<32x64xbf16>, vector<2x64xf32> -> vector<2x64xf32>
    %76 = vector.extract_strided_slice %3 {offsets = [6, 0], sizes = [1, 64], strides = [1, 1]} : vector<16x128xf32> to vector<1x64xf32>
    %77 = vector.broadcast %76 : vector<1x64xf32> to vector<2x64xf32>
    %78 = arith.addf %75, %77 : vector<2x64xf32>
    %cst_25 = arith.constant 0.000000e+00 : f32
    %79 = vector.broadcast %cst_25 : f32 to vector<2x64xf32>
    %80 = arith.maximumf %78, %79 : vector<2x64xf32>
    %81 = arith.truncf %80 : vector<2x64xf32> to vector<2x64xbf16>
    %c160 = arith.constant 160 : index
    %c0_26 = arith.constant 0 : index
    %82 = vector.load %arg2[%c160, %c0_26] : memref<448x128xbf16, #tpu.memory_space<vmem>>, vector<64x32xbf16>
    %cst_27 = arith.constant dense<0.000000e+00> : vector<2x32xf32>
    %83 = tpu.matmul %81, %82, %cst_27 {dimension_numbers = #tpu.dot_dimension_numbers<[1], [0], [0], [1], [0, 0, 1, 1], [], []>} : vector<2x64xbf16>, vector<64x32xbf16>, vector<2x32xf32> -> vector<2x32xf32>
    %84 = vector.extract_strided_slice %3 {offsets = [7, 0], sizes = [1, 32], strides = [1, 1]} : vector<16x128xf32> to vector<1x32xf32>
    %85 = vector.broadcast %84 : vector<1x32xf32> to vector<2x32xf32>
    %86 = arith.addf %83, %85 : vector<2x32xf32>
    %87 = arith.addf %72, %86 : vector<2x32xf32>
    %cst_28 = arith.constant dense<0.000000e+00> : vector<2xf32>
    %88 = vector.multi_reduction <add>, %87, %cst_28 [1] : vector<2x32xf32> to vector<2xf32>
    %89 = vector.shape_cast %88 : vector<2xf32> to vector<2x1xf32>
    %cst_29 = arith.constant 3.200000e+01 : f32
    %90 = vector.broadcast %cst_29 : f32 to vector<2x1xf32>
    %91 = arith.divf %89, %90 : vector<2x1xf32>
    %92 = vector.broadcast %91 : vector<2x1xf32> to vector<2x32xf32>
    %93 = arith.subf %87, %92 : vector<2x32xf32>
    %94 = vector.broadcast %91 : vector<2x1xf32> to vector<2x32xf32>
    %95 = arith.subf %87, %94 : vector<2x32xf32>
    %96 = arith.mulf %93, %95 : vector<2x32xf32>
    %cst_30 = arith.constant dense<0.000000e+00> : vector<2xf32>
    %97 = vector.multi_reduction <add>, %96, %cst_30 [1] : vector<2x32xf32> to vector<2xf32>
    %98 = vector.shape_cast %97 : vector<2xf32> to vector<2x1xf32>
    %cst_31 = arith.constant 3.200000e+01 : f32
    %99 = vector.broadcast %cst_31 : f32 to vector<2x1xf32>
    %100 = arith.divf %98, %99 : vector<2x1xf32>
    %101 = vector.broadcast %91 : vector<2x1xf32> to vector<2x32xf32>
    %102 = arith.subf %87, %101 : vector<2x32xf32>
    %cst_32 = arith.constant 9.99999974E-6 : f32
    %103 = vector.broadcast %cst_32 : f32 to vector<2x1xf32>
    %104 = arith.addf %100, %103 : vector<2x1xf32>
    %105 = math.rsqrt %104 : vector<2x1xf32>
    %106 = vector.broadcast %105 : vector<2x1xf32> to vector<2x32xf32>
    %107 = arith.mulf %102, %106 : vector<2x32xf32>
    %108 = vector.extract_strided_slice %3 {offsets = [8, 0], sizes = [1, 32], strides = [1, 1]} : vector<16x128xf32> to vector<1x32xf32>
    %109 = vector.broadcast %108 : vector<1x32xf32> to vector<2x32xf32>
    %110 = arith.mulf %107, %109 : vector<2x32xf32>
    %111 = vector.extract_strided_slice %3 {offsets = [9, 0], sizes = [1, 32], strides = [1, 1]} : vector<16x128xf32> to vector<1x32xf32>
    %112 = vector.broadcast %111 : vector<1x32xf32> to vector<2x32xf32>
    %113 = arith.addf %110, %112 : vector<2x32xf32>
    %114 = arith.truncf %113 : vector<2x32xf32> to vector<2x32xbf16>
    %c224 = arith.constant 224 : index
    %c0_33 = arith.constant 0 : index
    %115 = vector.load %arg2[%c224, %c0_33] : memref<448x128xbf16, #tpu.memory_space<vmem>>, vector<32x128xbf16>
    %cst_34 = arith.constant dense<0.000000e+00> : vector<2x128xf32>
    %116 = tpu.matmul %114, %115, %cst_34 {dimension_numbers = #tpu.dot_dimension_numbers<[1], [0], [0], [1], [0, 0, 1, 1], [], []>} : vector<2x32xbf16>, vector<32x128xbf16>, vector<2x128xf32> -> vector<2x128xf32>
    %117 = vector.extract_strided_slice %3 {offsets = [10, 0], sizes = [1, 128], strides = [1, 1]} : vector<16x128xf32> to vector<1x128xf32>
    %118 = vector.broadcast %117 : vector<1x128xf32> to vector<2x128xf32>
    %119 = arith.addf %116, %118 : vector<2x128xf32>
    %cst_35 = arith.constant 0.000000e+00 : f32
    %120 = vector.broadcast %cst_35 : f32 to vector<2x128xf32>
    %121 = arith.maximumf %119, %120 : vector<2x128xf32>
    %122 = arith.truncf %121 : vector<2x128xf32> to vector<2x128xbf16>
    %c256 = arith.constant 256 : index
    %c0_36 = arith.constant 0 : index
    %123 = vector.load %arg2[%c256, %c0_36] : memref<448x128xbf16, #tpu.memory_space<vmem>>, vector<128x64xbf16>
    %cst_37 = arith.constant dense<0.000000e+00> : vector<2x64xf32>
    %124 = tpu.matmul %122, %123, %cst_37 {dimension_numbers = #tpu.dot_dimension_numbers<[1], [0], [0], [1], [0, 0, 1, 1], [], []>} : vector<2x128xbf16>, vector<128x64xbf16>, vector<2x64xf32> -> vector<2x64xf32>
    %125 = vector.extract_strided_slice %3 {offsets = [11, 0], sizes = [1, 64], strides = [1, 1]} : vector<16x128xf32> to vector<1x64xf32>
    %126 = vector.broadcast %125 : vector<1x64xf32> to vector<2x64xf32>
    %127 = arith.addf %124, %126 : vector<2x64xf32>
    %cst_38 = arith.constant 0.000000e+00 : f32
    %128 = vector.broadcast %cst_38 : f32 to vector<2x64xf32>
    %129 = arith.maximumf %127, %128 : vector<2x64xf32>
    %130 = arith.truncf %129 : vector<2x64xf32> to vector<2x64xbf16>
    %c384 = arith.constant 384 : index
    %c0_39 = arith.constant 0 : index
    %131 = vector.load %arg2[%c384, %c0_39] : memref<448x128xbf16, #tpu.memory_space<vmem>>, vector<64x128xbf16>
    %cst_40 = arith.constant dense<0.000000e+00> : vector<2x128xf32>
    %132 = tpu.matmul %130, %131, %cst_40 {dimension_numbers = #tpu.dot_dimension_numbers<[1], [0], [0], [1], [0, 0, 1, 1], [], []>} : vector<2x64xbf16>, vector<64x128xbf16>, vector<2x128xf32> -> vector<2x128xf32>
    %133 = vector.extract_strided_slice %3 {offsets = [12, 0], sizes = [1, 128], strides = [1, 1]} : vector<16x128xf32> to vector<1x128xf32>
    %134 = vector.broadcast %133 : vector<1x128xf32> to vector<2x128xf32>
    %135 = arith.addf %132, %134 : vector<2x128xf32>
    %136 = arith.negf %135 : vector<2x128xf32>
    %137 = math.exp %136 : vector<2x128xf32>
    %cst_41 = arith.constant 1.000000e+00 : f32
    %138 = vector.broadcast %cst_41 : f32 to vector<2x128xf32>
    %139 = arith.addf %138, %137 : vector<2x128xf32>
    %140 = arith.divf %138, %139 : vector<2x128xf32>
    %c0_42 = arith.constant 0 : index
    %c0_43 = arith.constant 0 : index
    %141 = vector.load %arg4[%c0_42, %c0_43] : memref<2x128xf32, #tpu.memory_space<vmem>>, vector<2x128xf32>
    tpu.vector_store %arg4[%c0_42, %c0_43], %140 {strides = array<i32>} : memref<2x128xf32, #tpu.memory_space<vmem>>, vector<2x128xf32>,
    return
  }
}

</mosaic_0001>

<bundles_post_ra>
// kernel: tpu_custom_call.1
= control target key start
LH: loop header
LB: loop body
LE: loop exit
PB: predicated region body
PF: predicated region fallthrough
CT: control target
= control target key end

     0   :  { %9 = vsyncpa [#allocation3], 0  ;;  %s1431_s0 = inlined_call_operand.hbm [shape: f32[16,32], index: 0, kind: input, shape index: {}]   ;;  %s1432_s1 = inlined_call_operand.hbm [shape: f32[2,32], index: 1, kind: input, shape index: {}]   ;;  %s1433_s2 = inlined_call_operand.hbm [shape: bf16[448,128], index: 2, kind: input, shape index: {}]   ;;  %s1434_s3 = inlined_call_operand.hbm [shape: f32[16,128], index: 3, kind: input, shape index: {}]   ;;  %s1435_s4 = inlined_call_operand.hbm [shape: f32[2,128], index: 4, kind: output, shape index: {}]  }
   0x1   :  { %10 = vsyncpa [#allocation6], 0 }
   0x2   :  { %11 = vsyncpa [#allocation9], 0 }
   0x3   :  { %12 = vsyncpa [#allocation4], 0  ;;  %s1261_s15 = smov [#allocation5]   ;;  %s1262_s17 = smov [#allocation2]  }
   0x4   :  { %s31_s16 = sshll.u32 %s1261_s15, 4  ;;  %s18_s18 = sshll.u32 %s1262_s17, 4  ;;  %s32_s16 = int_to_ptr.vmem [resolvable:$true] %s31_s16  ;;  %s19_s18 = int_to_ptr.vmem [resolvable:$true] %s18_s18 }
   0x5   :  { %s1161_s19 = scalar_lea.vmem %s32_s16, 32  ;;  %p1166_p1 = scmp.lt.s32.totalorder %s32_s16, %s32_s16 }
   0x6   :  { %p1162_p0 = scmp.ne.s32.totalorder %s32_s16, %s1161_s19  ;;  %p1167_p2 = scmp.lt.s32.totalorder %s1161_s19, %s1161_s19 }
   0x8   :  { %p1168_p3 = por %p1167_p2, %p1166_p1 }
   0xa   :  { %p1169_p4 = pnand %p1168_p3, %p1162_p0 }
   0xc   :  { %1172 = shalt.err (!%p1169_p4)
}
   0xd   :  { %34 = dma.hbm_to_vmem [thread:$0]  %s1432_s1, 32, %s32_s16, [#allocation6]  }
   0xe   :  { %s1181_s22 = scalar_lea.vmem %s19_s18, 256  ;;  %p1186_p6 = scmp.lt.s32.totalorder %s19_s18, %s19_s18 }
   0xf   :  { %p1182_p5 = scmp.ne.s32.totalorder %s19_s18, %s1181_s22  ;;  %p1187_p7 = scmp.lt.s32.totalorder %s1181_s22, %s1181_s22 }
  0x11   :  { %p1188_p8 = por %p1187_p7, %p1186_p6 }
  0x13   :  { %p1189_p9 = pnand %p1188_p8, %p1182_p5 }
  0x15   :  { %1192 = shalt.err (!%p1189_p9)
}
  0x16   :  { %s1263_s23 = smov 128   ;;  %s1264_s24 = smov 8  }
  0x17   :  { %24 = dma.hbm_to_vmem [thread:$0]  %s1431_s0, 256, %s19_s18, [#allocation3], %s1263_s23, %s1263_s23, %s1264_s24  }
  0x18   :  { %s1265_s27 = smov [#allocation7]  }
  0x19   :  { %s40_s28 = sshll.u32 %s1265_s27, 4  ;;  %s41_s28 = int_to_ptr.vmem [resolvable:$true] %s40_s28 }
  0x1a   :  { %s1201_s29 = scalar_lea.vmem %s41_s28, 3584  ;;  %p1206_p11 = scmp.lt.s32.totalorder %s41_s28, %s41_s28 }
  0x1b   :  { %p1202_p10 = scmp.ne.s32.totalorder %s41_s28, %s1201_s29  ;;  %p1207_p12 = scmp.lt.s32.totalorder %s1201_s29, %s1201_s29 }
  0x1d   :  { %p1208_p13 = por %p1207_p12, %p1206_p11 }
  0x1f   :  { %p1209_p0 = pnand %p1208_p13, %p1202_p10 }
  0x21   :  { %1212 = shalt.err (!%p1209_p0)
}
  0x22   :  { %s1266_s1 = smov 64   ;;  %s1267_s30 = smov 4  }
  0x23   :  { %46 = dma.hbm_to_vmem [thread:$0]  %s1433_s2, 3584, %s41_s28, [#allocation6], %s1266_s1, %s1266_s1, %s1267_s30  }
  0x24   :  { %s1268_s7 = smov [#allocation8]  }
  0x25   :  { %s52_s8 = sshll.u32 %s1268_s7, 4  ;;  %s53_s8 = int_to_ptr.vmem [resolvable:$true] %s52_s8 }
  0x26   :  { %s1221_s0 = scalar_lea.vmem %s53_s8, 256  ;;  %p1226_p2 = scmp.lt.s32.totalorder %s53_s8, %s53_s8 }
  0x27   :  { %p1222_p1 = scmp.ne.s32.totalorder %s53_s8, %s1221_s0  ;;  %p1227_p3 = scmp.lt.s32.totalorder %s1221_s0, %s1221_s0 }
  0x29   :  { %p1228_p4 = por %p1227_p3, %p1226_p2 }
  0x2b   :  { %p1229_p5 = pnand %p1228_p4, %p1222_p1 }
  0x2d   :  { %1232 = shalt.err (!%p1229_p5)
}
  0x2e   :  { %58 = dma.hbm_to_vmem [thread:$0]  %s1434_s3, 256, %s53_s8, [#allocation9], %s1263_s23, %s1263_s23, %s1264_s24  }
  0x2f   :  { %1253 = dma.done.wait [#allocation3], 256  }
  0x30   :  { %1254 = vsyncadd [#allocation3], 4294967040 }
  0x31   :  { %1255 = dma.done.wait [#allocation6], 3616  }
  0x32   :  { %1256 = vsyncadd [#allocation6], 4294963680 }
  0x33   :  { %1257 = dma.done.wait [#allocation9], 256  }
  0x34   :  { %1258 = vsyncadd [#allocation9], 4294967040  ;;  %v1269_v0 = vmov 0.0   ;;  %vm1270_vm0 = vmmov 0   ;;  %v1113_v1 = vld [vmem:[#allocation7 + $0x8] sm:$0xff]   ;;  %v1114_v2 = vld [vmem:[#allocation7] sm:$0xff]   ;;  %v83_v10 = vlaneseq }
  0x35   :  { %998 = vmatprep.subr.bf16.mxu1 %v1269_v0  ;;  %1002 = vmatprep.mubr.msk.bf16.mxu1 %vm1270_vm0, %v1269_v0  ;;  %v1315_v3 = vld [vmem:[#allocation5] sm:$0x3]  ;;  %vm99_vm1 = vcmask 261120   ;;  %v1116_v6 = vld [vmem:[#allocation7 + $0x10] sm:$0xff]   ;;  %v1332_v17 = vld [vmem:[#allocation8] sm:$0xff]  ;;  %vm321_vm2 = vcmask 123904  }
  0x36   :  { %1014 = vmatprep.subr.bf16.mxu0 %v1269_v0  ;;  %1018 = vmatprep.mubr.msk.bf16.mxu0 %vm1270_vm0, %v1269_v0  ;;  %v78_v4 = vpack.c.bf16 %v1315_v3, %v1315_v3  ;;  %v1115_v5 = vld [vmem:[#allocation7 + $0x18] sm:$0xff]   ;;  %v72_v7 = vld [vmem:[#allocation2] sm:$0xff]  ;;  %v1329_v13 = vshrl.u32 %v83_v10, 7  ;;  %v1118_v32 = vld [vmem:[#allocation7 + $0x20] sm:$0xff]   ;;  %vm335_vm3 = vcmask 130048   ;;  %vm444_vm4 = vcmask 254976  }
  0x37   :  { %999 = vmatpush3.bf16.msra.mxu1 %v1113_v1  ;;  %v73_v8 = vld [vmem:[#allocation2 + $0x8] sm:$0xff]  ;;  %v1117_v31 = vld [vmem:[#allocation7 + $0x28] sm:$0xff]   ;;  %vm571_vm5 = vcmask 523264   ;;  %s1271_s2 = smov [#allocation10]  }
  0x38   :  { %1000 = vmatprep.subr.bf16.mxu1 %v1269_v0  ;;  %v74_v9 = vpack.c.bf16 %v73_v8, %v72_v7  ;;  %v149_v15 = vsub.s32 1, %v1329_v13  ;;  %v85_v21 = vsub.s32 0, %v1329_v13  ;;  %1015 = vmatpush3.bf16.msra.mxu0 %v1117_v31  ;;  %v1351_v33 = vld [vmem:[#allocation8 + $0x8] sm:$0xff]  ;;  %v213_v49 = vsub.s32 2, %v1329_v13  ;;  %v1119_v56 = vld [vmem:[#allocation7 + $0x38] sm:$0xff]   ;;  %v1120_v61 = vld [vmem:[#allocation7 + $0x30] sm:$0xff]  }
  0x39   :  { %1016 = vmatprep.subr.bf16.mxu0 %v1269_v0  ;;  %v318_v34 = vrot.slane %v1351_v33, 5  ;;  %s907_s3 = sshll.u32 %s1271_s2, 4  ;;  %s908_s3 = int_to_ptr.vmem [resolvable:$true] %s907_s3 }
  0x3a   :  { %v150_v19 = vrot.slane %v1332_v17, %v149_v15  ;;  %v86_v26 = vrot.slane %v1332_v17, %v85_v21  ;;  %v214_v50 = vrot.slane %v1332_v17, %v213_v49  ;;  %s1233_s11 = scalar_lea.vmem %s908_s3, 32  ;;  %p1238_p7 = scmp.lt.s32.totalorder %s908_s3, %s908_s3 }
  0x3b   :  { %1001 = vmatpush3.bf16.msra.mxu1 %v1114_v2  ;;  %p1234_p6 = scmp.ne.s32.totalorder %s908_s3, %s1233_s11  ;;  %p1239_p8 = scmp.lt.s32.totalorder %s1233_s11, %s1233_s11 }
  0x3c   :  { %1006 = vmatprep.subr.bf16.mxu1 %v1269_v0  ;;  %1017 = vmatpush3.bf16.msra.mxu0 %v1118_v32 }
  0x3d   :  { %1028 = vmatprep.subr.bf16.mxu0 %v1269_v0  ;;  %p1240_p9 = por %p1239_p8, %p1238_p7 }
  0x3e   :  { %1003 = vmatmul.mubr.msk.bf16.vlgmr.msra.gmra.mxu1 %vm99_vm1, %v78_v4 }
  0x3f   :  { %1007 = vmatpush3.bf16.msra.mxu1 %v1115_v5  ;;  %1010 = vmatprep.mubr.msk.bf16.mxu1 %vm1270_vm0, %v1269_v0  ;;  %v386_v5 = vsub.s32 3, %v1329_v13  ;;  %p1241_p10 = pnand %p1240_p9, %p1234_p6 }
  0x40   :  { %1008 = vmatprep.subr.bf16.mxu1 %v1269_v0  ;;  %1019 = vmatmul.mubr.msk.bf16.vlgmr.msra.gmra.mxu0 %vm99_vm1, %v74_v9 }
  0x41   :  { %1030 = vmatprep.mubr.msk.bf16.mxu0 %vm1270_vm0, %v1269_v0 }
  0x43   :  { %1009 = vmatpush3.bf16.msra.mxu1 %v1116_v6  ;;  %v387_v6 = vrot.slane %v1332_v17, %v386_v5 }
  0x44   :  { %1022 = vmatprep.subr.bf16.mxu1 %v1269_v0 }
  0x46   :  { %1011 = vmatmul.mubr.msk.bf16.vlgmr.msra.gmra.mxu1 %vm99_vm1, %v74_v9 }
  0x47   :  { %1024 = vmatprep.mubr.msk.bf16.mxu1 %vm1270_vm0, %v1269_v0 }
  0xfe   :  { %v137_v11 = vpop.f32.mrf.mxu1 }
  0xff   :  { %v138_v29 = vadd.f32 %v137_v11, %v86_v26 }
 0x100   :  { %v1004_v12 = vpop.f32.mrf.mxu1  ;;  %v261_v42 = vpop.f32.mrf.mxu0 }
 0x101   :  { %v268_v30 = vpack.c.bf16 %v138_v29, %v138_v29  ;;  %v262_v51 = vadd.f32 %v261_v42, %v214_v50  ;;  %v461_v29 = vsub.s32 4, %v1329_v13 }
 0x102   :  { %v140_v14 = vpop.f32.mrf.mxu1  ;;  %v1020_v43 = vpop.f32.mrf.mxu0 }
 0x103   :  { %v462_v31 = vrot.slane %v1332_v17, %v461_v29 }
 0x104   :  { %v1005_v16 = vpop.f32.mrf.mxu1  ;;  %v264_v52 = vpop.f32.mrf.mxu0 }
 0x105   :  { %v265_v53 = vadd.f32 %v264_v52, %v214_v50 }
 0x106   :  { %v200_v18 = vpop.f32.mrf.mxu1  ;;  %v1021_v54 = vpop.f32.mrf.mxu0 }
 0x107   :  { %v201_v23 = vadd.f32 %v200_v18, %v150_v19  ;;  %v334_v55 = vpack.c.bf16 %v265_v53, %v262_v51  ;;  %v545_v51 = vsub.s32 7, %v1329_v13 }
 0x108   :  { %v1012_v20 = vpop.f32.mrf.mxu1 }
 0x109   :  { %1029 = vmatpush3.bf16.msra.mxu0 %v334_v55  ;;  %v546_v52 = vrot.slane %v1332_v17, %v545_v51 }
 0x10a   :  { %v203_v22 = vpop.f32.mrf.mxu1  ;;  %1042 = vmatprep.subr.bf16.mxu0 %v1269_v0 }
 0x10b   :  { %v204_v24 = vadd.f32 %v203_v22, %v150_v19 }
 0x10c   :  { %v1013_v25 = vpop.f32.mrf.mxu1 }
 0x10d   :  { %v269_v27 = vpack.c.bf16 %v204_v24, %v201_v23  ;;  %v1121_v23 = vld [vmem:[#allocation7 + $0x48] sm:$0xff]   ;;  %v1122_v24 = vld [vmem:[#allocation7 + $0x40] sm:$0xff]  }
 0x10e   :  { %v1124_v25 = vld [vmem:[#allocation7 + $0x60] sm:$0xff]  }
 0x10f   :  { %v274_v28 = vsel %vm99_vm1, %v269_v27, 0 }
 0x110   :  { %1023 = vmatpush3.bf16.xpose.msra.mxu1 %v274_v28 }
 0x111   :  { %1034 = vmatprep.subr.bf16.mxu1 %v1269_v0 }
 0x117   :  { %1025 = vmatmul.mubr.msk.bf16.vlgmr.msra.gmra.mxu1 %vm99_vm1, %v268_v30  ;;  %v466_v30 = vsub.s32 5, %v1329_v13 }
 0x118   :  { %1038 = vmatprep.mubr.msk.bf16.mxu1 %vm1270_vm0, %v1269_v0  ;;  %1035 = vmatpush3.bf16.msra.mxu1 %v1119_v56 }
 0x119   :  { %1036 = vmatprep.subr.bf16.mxu1 %v1269_v0 }
 0x11c   :  { %1037 = vmatpush3.bf16.msra.mxu1 %v1120_v61 }
 0x11d   :  { %1050 = vmatprep.subr.bf16.mxu1 %v1269_v0 }
 0x1d7   :  { %v310_v35 = vpop.f32.mrf.mxu1 }
 0x1d8   :  { %v316_v36 = vmul.f32 0.17677669, %v310_v35  ;;  %v467_v35 = vrot.slane %v1332_v17, %v466_v30 }
 0x1d9   :  { %v1026_v37 = vpop.f32.mrf.mxu1 }
 0x1da   :  { %v320_v38 = vadd.f32 %v318_v34, %v316_v36 }
 0x1db   :  { %v313_v39 = vpop.f32.mrf.mxu1 }
 0x1dc   :  { %v322_v40 = vsel %vm321_vm2, %v320_v38, -inf  ;;  %v1125_v39 = vld [vmem:[#allocation7 + $0x58] sm:$0xff]  }
 0x1dd   :  { %323 = vmax.xlane.f32.xlu0 %v322_v40  ;;  %v1027_v41 = vpop.f32.mrf.mxu1  ;;  %v1126_v40 = vld [vmem:[#allocation7 + $0x50] sm:$0xff]  }
 0x1de   :  { %v476_v41 = vsub.s32 6, %v1329_v13 }
 0x1e0   :  { %v477_v42 = vrot.slane %v1332_v17, %v476_v41 }
 0x266   :  { %v324_v44 = vpop.xlane.xlu0 %323 }
 0x267   :  { %v325_v45 = vsub.f32 %v320_v38, %v324_v44 }
 0x269   :  { %v326_v46 = vmul.f32 1.442695, %v325_v45 }
 0x26b   :  { %1141 = vpow2.f32 %v326_v46 }
 0x278   :  { %v1142_v47 = vpop.eup %1141 }
 0x279   :  { %v328_v48 = vsel %vm321_vm2, %v1142_v47, 0.0 }
 0x27a   :  { %329 = vadd.xlane.f32.xlu0 %v328_v48 }
 0x303   :  { %v330_v57 = vpop.xlane.xlu0 %329 }
 0x304   :  { %1143 = vrcp.f32 %v330_v57 }
 0x311   :  { %v1144_v58 = vpop.eup %1143 }
 0x312   :  { %v332_v59 = vmul.f32 %v1144_v58, %v1142_v47 }
 0x314   :  { %v333_v60 = vpack.c.bf16 %v332_v59, %v332_v59 }
 0x316   :  { %1031 = vmatmul.mubr.msk.bf16.vlgmr.msra.gmra.mxu0 %vm335_vm3, %v333_v60 }
 0x317   :  { %1046 = vmatprep.mubr.msk.bf16.mxu0 %vm1270_vm0, %v1269_v0  ;;  %1043 = vmatpush3.bf16.msra.mxu0 %v1121_v23  ;;  %v1135_v23 = vld [vmem:[#allocation7 + $0x88] sm:$0xff]  }
 0x318   :  { %1044 = vmatprep.subr.bf16.mxu0 %v1269_v0 }
 0x31b   :  { %1045 = vmatpush3.bf16.msra.mxu0 %v1122_v24  ;;  %v1136_v24 = vld [vmem:[#allocation7 + $0x80] sm:$0xff]  }
 0x31c   :  { %1062 = vmatprep.subr.bf16.mxu0 %v1269_v0 }
 0x3d6   :  { %v373_v62 = vpop.f32.mrf.mxu0 }
 0x3d7   :  { %v379_v63 = vpack.c.bf16 %v373_v62, %v373_v62 }
 0x3d8   :  { %v1032_v1 = vpop.f32.mrf.mxu0 }
 0x3d9   :  { %1039 = vmatmul.mubr.msk.bf16.vlgmr.msra.gmra.mxu1 %vm99_vm1, %v379_v63 }
 0x3da   :  { %v376_v2 = vpop.f32.mrf.mxu0  ;;  %1058 = vmatprep.mubr.msk.bf16.mxu1 %vm1270_vm0, %v1269_v0 }
 0x3db   :  { %v1127_v2 = vld [vmem:[#allocation7 + $0x78] sm:$0xff]  }
 0x3dc   :  { %v1033_v4 = vpop.f32.mrf.mxu0 }
 0x3dd   :  { %v1128_v4 = vld [vmem:[#allocation7 + $0x70] sm:$0xff]  }
 0x499   :  { %v437_v7 = vpop.f32.mrf.mxu1 }
 0x49a   :  { %v438_v8 = vadd.f32 %v437_v7, %v387_v6 }
 0x49b   :  { %v1040_v9 = vpop.f32.mrf.mxu1 }
 0x49c   :  { %v443_v10 = vadd.f32 %v438_v8, %v1315_v3  ;;  %v1123_v3 = vld [vmem:[#allocation7 + $0x68] sm:$0xff]   ;;  %v632_v8 = vrot.slane %v1351_v33, %v85_v21 }
 0x49d   :  { %v440_v11 = vpop.f32.mrf.mxu1  ;;  %1051 = vmatpush3.bf16.msra.mxu1 %v1123_v3  ;;  %v1131_v21 = vld [vmem:[#allocation7 + $0xa8] sm:$0xff]   ;;  %v1137_v3 = vld [vmem:[#allocation7 + $0xd8] sm:$0xff]  }
 0x49e   :  { %v445_v12 = vsel %vm444_vm4, %v443_v10, 0.0  ;;  %1052 = vmatprep.subr.bf16.mxu1 %v1269_v0 }
 0x49f   :  { %446 = vadd.xlane.f32.xlu1 %v445_v12  ;;  %v1041_v14 = vpop.f32.mrf.mxu1 }
 0x4a1   :  { %1053 = vmatpush3.bf16.msra.mxu1 %v1124_v25  ;;  %v1138_v25 = vld [vmem:[#allocation7 + $0xd0] sm:$0xff]  }
 0x4a2   :  { %1054 = vmatprep.subr.bf16.mxu1 %v1269_v0 }
 0x4a5   :  { %1055 = vmatpush3.bf16.msra.mxu1 %v1125_v39 }
 0x4a6   :  { %1056 = vmatprep.subr.bf16.mxu1 %v1269_v0 }
 0x4a9   :  { %1057 = vmatpush3.bf16.msra.mxu1 %v1126_v40 }
 0x4aa   :  { %1090 = vmatprep.subr.bf16.mxu1 %v1269_v0 }
 0x528   :  { %v447_v16 = vpop.xlane.xlu1 %446 }
 0x529   :  { %v449_v18 = vmul.f32 0.03125, %v447_v16  ;;  %v1129_v16 = vld [vmem:[#allocation7 + $0xb8] sm:$0xff]  }
 0x52b   :  { %v450_v19 = vsub.f32 %v443_v10, %v449_v18  ;;  %v637_v10 = vrot.slane %v1351_v33, %v149_v15  ;;  %v1132_v15 = vld [vmem:[#allocation7 + $0xa0] sm:$0xff]  }
 0x52d   :  { %v451_v20 = vmul.f32 %v450_v19, %v450_v19 }
 0x52f   :  { %v452_v22 = vsel %vm444_vm4, %v451_v20, 0.0  ;;  %v1133_v20 = vld [vmem:[#allocation7 + $0x98] sm:$0xff]  }
 0x530   :  { %453 = vadd.xlane.f32.xlu1 %v452_v22  ;;  %v1134_v22 = vld [vmem:[#allocation7 + $0x90] sm:$0xff]  }
 0x5b9   :  { %v454_v26 = vpop.xlane.xlu1 %453 }
 0x5ba   :  { %v455_v27 = vmul.f32 0.03125, %v454_v26  ;;  %v647_v26 = vrot.slane %v1351_v33, %v213_v49 }
 0x5bc   :  { %v456_v28 = vadd.f32 1e-05, %v455_v27 }
 0x5be   :  { %1145 = vrsqrt.f32 %v456_v28 }
 0x5cb   :  { %v1146_v32 = vpop.eup %1145 }
 0x5cc   :  { %v458_v34 = vmul.f32 %v1146_v32, %v450_v19  ;;  %v1130_v19 = vld [vmem:[#allocation7 + $0xb0] sm:$0xff]  }
 0x5ce   :  { %v463_v36 = vmul.f32 %v462_v31, %v458_v34 }
 0x5d0   :  { %v468_v37 = vadd.f32 %v467_v35, %v463_v36  ;;  %v1139_v36 = vld [vmem:[#allocation7 + $0xc8] sm:$0xff]  }
 0x5d2   :  { %v469_v38 = vpack.c.bf16 %v468_v37, %v468_v37 }
 0x5d4   :  { %1047 = vmatmul.mubr.msk.bf16.vlgmr.msra.gmra.mxu0 %vm99_vm1, %v469_v38  ;;  %v724_v38 = vrot.slane %v1351_v33, %v386_v5 }
 0x5d5   :  { %1066 = vmatprep.mubr.msk.bf16.mxu0 %vm1270_vm0, %v1269_v0  ;;  %1063 = vmatpush3.bf16.msra.mxu0 %v1127_v2 }
 0x5d6   :  { %1064 = vmatprep.subr.bf16.mxu0 %v1269_v0 }
 0x5d9   :  { %1065 = vmatpush3.bf16.msra.mxu0 %v1128_v4 }
 0x5da   :  { %1070 = vmatprep.subr.bf16.mxu0 %v1269_v0 }
 0x694   :  { %v527_v43 = vpop.f32.mrf.mxu0 }
 0x695   :  { %v528_v44 = vadd.f32 %v527_v43, %v477_v42 }
 0x696   :  { %v1048_v45 = vpop.f32.mrf.mxu0 }
 0x697   :  { %v533_v46 = vmax.f32 %v528_v44, 0.0  ;;  %v826_v45 = vrot.slane %v1351_v33, %v461_v29 }
 0x698   :  { %v530_v47 = vpop.f32.mrf.mxu0 }
 0x699   :  { %v534_v48 = vpack.c.bf16 %v533_v46, %v533_v46 }
 0x69a   :  { %v1049_v50 = vpop.f32.mrf.mxu0 }
 0x69b   :  { %1059 = vmatmul.mubr.msk.bf16.vlgmr.msra.gmra.mxu1 %vm571_vm5, %v534_v48 }
 0x69c   :  { %1098 = vmatprep.mubr.msk.bf16.mxu1 %vm1270_vm0, %v1269_v0  ;;  %1091 = vmatpush3.bf16.msra.mxu1 %v1137_v3 }
 0x69d   :  { %1092 = vmatprep.subr.bf16.mxu1 %v1269_v0 }
 0x6a0   :  { %1093 = vmatpush3.bf16.msra.mxu1 %v1138_v25 }
 0x6a1   :  { %1094 = vmatprep.subr.bf16.mxu1 %v1269_v0 }
 0x6a4   :  { %1095 = vmatpush3.bf16.msra.mxu1 %v1139_v36 }
 0x6a5   :  { %1096 = vmatprep.subr.bf16.mxu1 %v1269_v0 }
 0x75b   :  { %v609_v53 = vpop.f32.mrf.mxu1 }
 0x75c   :  { %v610_v54 = vadd.f32 %v609_v53, %v546_v52 }
 0x75d   :  { %v1060_v55 = vpop.f32.mrf.mxu1 }
 0x75e   :  { %v615_v56 = vadd.f32 %v610_v54, %v468_v37  ;;  %v1140_v37 = vld [vmem:[#allocation7 + $0xc0] sm:$0xff]  }
 0x75f   :  { %v612_v57 = vpop.f32.mrf.mxu1  ;;  %1097 = vmatpush3.bf16.msra.mxu1 %v1140_v37 }
 0x760   :  { %v616_v58 = vsel %vm444_vm4, %v615_v56, 0.0 }
 0x761   :  { %617 = vadd.xlane.f32.xlu0 %v616_v58  ;;  %v1061_v59 = vpop.f32.mrf.mxu1 }
 0x7ea   :  { %v618_v60 = vpop.xlane.xlu0 %617 }
 0x7eb   :  { %v619_v61 = vmul.f32 0.03125, %v618_v60 }
 0x7ed   :  { %v620_v62 = vsub.f32 %v615_v56, %v619_v61 }
 0x7ef   :  { %v621_v63 = vmul.f32 %v620_v62, %v620_v62 }
 0x7f1   :  { %v622_v1 = vsel %vm444_vm4, %v621_v63, 0.0 }
 0x7f2   :  { %623 = vadd.xlane.f32.xlu1 %v622_v1 }
 0x87b   :  { %v624_v17 = vpop.xlane.xlu1 %623 }
 0x87c   :  { %v625_v6 = vmul.f32 0.03125, %v624_v17 }
 0x87e   :  { %v626_v7 = vadd.f32 1e-05, %v625_v6 }
 0x880   :  { %1147 = vrsqrt.f32 %v626_v7 }
 0x88d   :  { %v1148_v9 = vpop.eup %1147 }
 0x88e   :  { %v628_v11 = vmul.f32 %v1148_v9, %v620_v62 }
 0x890   :  { %v633_v12 = vmul.f32 %v632_v8, %v628_v11 }
 0x892   :  { %v638_v14 = vadd.f32 %v637_v10, %v633_v12 }
 0x894   :  { %v639_v18 = vpack.c.bf16 %v638_v14, %v638_v14 }
 0x896   :  { %1067 = vmatmul.mubr.msk.bf16.vlgmr.msra.gmra.mxu0 %vm99_vm1, %v639_v18 }
 0x897   :  { %1071 = vmatpush3.bf16.msra.mxu0 %v1129_v16  ;;  %1086 = vmatprep.mubr.msk.bf16.mxu0 %vm1270_vm0, %v1269_v0 }
 0x898   :  { %1072 = vmatprep.subr.bf16.mxu0 %v1269_v0 }
 0x89b   :  { %1073 = vmatpush3.bf16.msra.mxu0 %v1130_v19 }
 0x89c   :  { %1074 = vmatprep.subr.bf16.mxu0 %v1269_v0 }
 0x89f   :  { %1075 = vmatpush3.bf16.msra.mxu0 %v1131_v21 }
 0x8a0   :  { %1076 = vmatprep.subr.bf16.mxu0 %v1269_v0 }
 0x8a3   :  { %1077 = vmatpush3.bf16.msra.mxu0 %v1132_v15 }
 0x8a4   :  { %1078 = vmatprep.subr.bf16.mxu0 %v1269_v0 }
 0x8a7   :  { %1079 = vmatpush3.bf16.msra.mxu0 %v1133_v20 }
 0x8a8   :  { %1080 = vmatprep.subr.bf16.mxu0 %v1269_v0 }
 0x8ab   :  { %1081 = vmatpush3.bf16.msra.mxu0 %v1134_v22 }
 0x8ac   :  { %1082 = vmatprep.subr.bf16.mxu0 %v1269_v0 }
 0x8af   :  { %1083 = vmatpush3.bf16.msra.mxu0 %v1135_v23 }
 0x8b0   :  { %1084 = vmatprep.subr.bf16.mxu0 %v1269_v0 }
 0x8b3   :  { %1085 = vmatpush3.bf16.msra.mxu0 %v1136_v24 }
 0x956   :  { %v697_v27 = vpop.f32.mrf.mxu0 }
 0x957   :  { %v698_v28 = vadd.f32 %v697_v27, %v647_v26 }
 0x958   :  { %v1068_v30 = vpop.f32.mrf.mxu0 }
 0x959   :  { %v703_v31 = vmax.f32 %v698_v28, 0.0 }
 0x95a   :  { %v700_v32 = vpop.f32.mrf.mxu0 }
 0x95b   :  { %v704_v34 = vpack.c.bf16 %v703_v31, %v703_v31 }
 0x95c   :  { %v1069_v35 = vpop.f32.mrf.mxu0 }
 0x95d   :  { %1087 = vmatmul.mubr.bf16.vlgmr.msra.gmra.mxu0 %v704_v34 }
 0xa1d   :  { %v807_v39 = vpop.f32.mrf.mxu0 }
 0xa1e   :  { %v808_v49 = vadd.f32 %v807_v39, %v724_v38 }
 0xa1f   :  { %v1088_v40 = vpop.f32.mrf.mxu0 }
 0xa20   :  { %v813_v41 = vmax.f32 %v808_v49, 0.0 }
 0xa21   :  { %v810_v42 = vpop.f32.mrf.mxu0 }
 0xa22   :  { %v814_v43 = vpack.c.bf16 %v813_v41, %v813_v41 }
 0xa23   :  { %v1089_v44 = vpop.f32.mrf.mxu0 }
 0xa24   :  { %1099 = vmatmul.mubr.msk.bf16.vlgmr.msra.gmra.mxu1 %vm571_vm5, %v814_v43 }
 0xae4   :  { %v888_v0 = vpop.f32.mrf.mxu1 }
 0xae5   :  { %v889_v46 = vadd.f32 %v888_v0, %v826_v45 }
 0xae6   :  { %v1100_v47 = vpop.f32.mrf.mxu1 }
 0xae7   :  { %v956_v48 = vmul.f32 -1.442695, %v889_v46 }
 0xae8   :  { %v891_v50 = vpop.f32.mrf.mxu1 }
 0xae9   :  { %1149 = vpow2.f32 %v956_v48 }
 0xaea   :  { %v1101_v5 = vpop.f32.mrf.mxu1 }
 0xaf6   :  { %v1150_v51 = vpop.eup %1149 }
 0xaf7   :  { %v897_v52 = vadd.f32 1.0, %v1150_v51 }
 0xaf9   :  { %1151 = vrcp.f32 %v897_v52 }
 0xb06   :  { %v1152_v53 = vpop.eup %1151 }
 0xb07   :  { %900 = vst [vmem:[#allocation10] sm:$0x3] %v1152_v53 }
 0xb08   :  { %1244 = shalt.err (!%p1241_p10)
}
 0xb09   :  { %910 = dma.vmem_to_hbm [thread:$0]  %s908_s3, 32, %s1435_s4, [#allocation4]  }
 0xb0a   :  { %1259 = dma.done.wait [#allocation4], 32  }
 0xb0b   :  { %1260 = vsyncadd [#allocation4], 4294967264 }
 0xb0c   :  { %914 = vsyncpa [#allocation3], 1 }
 0xb0d   :  { %915 = vsyncpa [#allocation6], 1 }
 0xb0e   :  { %916 = vsyncpa [#allocation9], 1 }
 0xb0f   :  { %917 = vsyncpa [#allocation4], 1 }

</bundles_post_ra>
